<compile_context>
chip_gen: v7x
topology: tpu7x:2x2x1
jax: 0.10.0
libtpu: 0.0.40
codegen_flags: <defaults>
</compile_context>

<pallas_src>
import jax
import jax.numpy as jnp
from jax.experimental import pallas as pl
from jax.experimental.pallas import tpu as pltpu

LANE = 128      # vreg lane width  (last dim alignment)
SUBLANE = 8     # vreg sublane count (second-to-last dim alignment)


def _round_up(x, m):
    return (x + m - 1) // m * m


def _pad2(a, rows, cols):
    pr, pc = rows - a.shape[0], cols - a.shape[1]
    if pr == 0 and pc == 0:
        return a
    return jnp.pad(a, ((0, pr), (0, pc)))


def _bspec(shape, index_map, mode=None):
    """BlockSpec helper: only pass pipeline_mode when explicitly requested."""
    if mode is None:
        return pl.BlockSpec(shape, index_map)
    return pl.BlockSpec(shape, index_map, pipeline_mode=mode)


def _vmem_capacity_bytes():
    try:
        return int(pltpu.get_tpu_info().vmem_capacity_bytes)
    except Exception:
        return 128 << 20   # v5e/v6e physical VMEM; conservative default


# ----------------------------------------------------------------------------
# Kernels
# ----------------------------------------------------------------------------
def classifier_kernel(x_ref, w1_ref, b1_ref, w2_ref, b2_ref, o_ref):
    """Fused MLP tile, weights VMEM-resident:  out = relu(x @ W1 + b1) @ W2 + b2.

    x_ref:  [TB, Dm_p]   (streams per grid step)
    w1_ref: [Dm_p, Dh_p] (resident)     b1_ref: [1, Dh_p]
    w2_ref: [Dh_p, Nc_p] (resident)     b2_ref: [1, Nc_p]
    o_ref:  [TB, Nc_p]
    """
    x = x_ref[...]
    h = jnp.dot(x, w1_ref[...], preferred_element_type=jnp.float32)
    h = jnp.maximum(h + b1_ref[...].astype(jnp.float32), 0.0)
    logits = jnp.dot(h.astype(w2_ref.dtype), w2_ref[...],
                     preferred_element_type=jnp.float32)
    o_ref[...] = (logits + b2_ref[...].astype(jnp.float32)).astype(o_ref.dtype)


def classifier_kernel_ktiled(x_ref, w1_ref, b1_ref, w2_ref, b2_ref, o_ref,
                             acc_ref):
    """Contraction-tiled fallback: d_model split over grid axis 1 (reduction
    axis last, 'arbitrary'); hidden pre-activation accumulated in f32 VMEM.

    x_ref:  [TB, TK]      w1_ref: [TK, Dh_p]   (both stream over k)
    b1/w2/b2 resident;    acc_ref: [TB, Dh_p] f32 scratch;   o_ref: [TB, Nc_p]
    """
    k = pl.program_id(1)

    @pl.when(k == 0)
    def _():
        acc_ref[...] = jnp.zeros_like(acc_ref)

    acc_ref[...] += jnp.dot(x_ref[...], w1_ref[...],
                            preferred_element_type=jnp.float32)

    @pl.when(k == pl.num_programs(1) - 1)
    def _():
        h = jnp.maximum(acc_ref[...] + b1_ref[...].astype(jnp.float32), 0.0)
        logits = jnp.dot(h.astype(w2_ref.dtype), w2_ref[...],
                         preferred_element_type=jnp.float32)
        o_ref[...] = (logits + b2_ref[...].astype(jnp.float32)).astype(o_ref.dtype)


# ----------------------------------------------------------------------------
# Parameter prep (one-time, hoisted out of the forward path)
# ----------------------------------------------------------------------------
def prepare_params(w1, b1, w2, b2):
    """Zero-pad weights/biases to lane-dense shapes once.

    Zero padding preserves semantics exactly: padded input columns multiply
    zero weight rows; padded hidden/output columns carry zero bias and are
    either multiplied by zero weight rows or sliced off after the call.
    """
    d_model, d_hidden = w1.shape
    n_class = w2.shape[1]
    dm_p = _round_up(d_model, LANE)
    dh_p = _round_up(d_hidden, LANE)
    nc_p = _round_up(n_class, LANE)
    w1_p = _pad2(w1, dm_p, dh_p)
    b1_p = _pad2(b1.reshape(1, -1), 1, dh_p)
    w2_p = _pad2(w2, dh_p, nc_p)
    b2_p = _pad2(b2.reshape(1, -1), 1, nc_p)
    return (w1_p, b1_p, w2_p, b2_p), (d_model, d_hidden, n_class)


# ----------------------------------------------------------------------------
# Tile selection
# ----------------------------------------------------------------------------
def _pick_batch_tile(B, tile_b):
    """Pick (tb, padded_B).  tb is always a sublane multiple (lowering req)."""
    tile_b = max(SUBLANE, _round_up(int(tile_b), SUBLANE))
    if B <= tile_b:
        if B >= 2 * SUBLANE:
            # >=2 grid steps so v7x's second TensorCore gets a tile
            # (per-step overhead ~0.35us, a no-op cost on v5e/v6e).
            tb = _round_up((B + 1) // 2, SUBLANE)
        else:
            tb = _round_up(B, SUBLANE)
    else:
        # Adaptive tile: minimize batch-padding waste, prefer larger tiles
        # (streaming roofline: 512/1024 >> 128).  All candidates lane/sublane
        # friendly multiples of 128; tie-break toward the larger tile.
        cands = sorted({c for c in (1024, 512, 384, 256, 128, tile_b)
                        if SUBLANE <= c <= tile_b})
        tb = min(cands, key=lambda c: (_round_up(B, c) - B, -c))
    return tb, _round_up(B, tb)


def _pick_k_tile(dm_p, k_tile_target):
    """Largest multiple of 128 that divides dm_p and is <= k_tile_target."""
    m = dm_p // LANE
    best = 1
    for d in range(1, m + 1):
        if m % d == 0 and LANE * d <= max(LANE, int(k_tile_target)):
            best = d
    return LANE * best


# ----------------------------------------------------------------------------
# Forward
# ----------------------------------------------------------------------------
def classifier_forward(x, prepared, *, tile_b=512, out_dtype=None,
                       x_buffers=2, k_tile=512, force_ktiled=False):
    """out = relu(x @ W1 + b1) @ W2 + b2  via a fused Pallas kernel.

    x:        [B, d_model]
    prepared: output of prepare_params() (padded weights + true dims)
    returns:  [B, n_class] logits in `out_dtype` (default: x.dtype).
    """
    (w1_p, b1_p, w2_p, b2_p), (d_model, d_hidden, n_class) = prepared
    B, dm_in = x.shape
    assert dm_in == d_model, "x feature dim does not match the prepared weights"
    dm_p, dh_p = w1_p.shape
    nc_p = w2_p.shape[1]
    out_dtype = x.dtype if out_dtype is None else jnp.dtype(out_dtype)

    x_item = jnp.dtype(x.dtype).itemsize
    w_item = jnp.dtype(w1_p.dtype).itemsize
    o_item = jnp.dtype(out_dtype).itemsize

    tb, b_p = _pick_batch_tile(B, tile_b)
    num_bt = b_p // tb

    # Only per-call padding is on x (weights were padded once up-front).
    if (b_p, dm_p) != (B, d_model):
        x_p = jnp.pad(x, ((0, b_p - B), (0, dm_p - d_model)))
    else:
        x_p = x

    # Generation-aware VMEM budget (v7x: 64 MiB physical -> ~51 MiB cap;
    # v5e/v6e: 128 MiB -> ~102 MiB cap).
    vmem_cap = max(int(_vmem_capacity_bytes() * 0.8), 32 << 20)

    x_buffers = max(2, int(x_buffers))
    stream_bytes = x_buffers * tb * dm_p * x_item + 2 * tb * nc_p * o_item
    weights_1x = (dm_p * dh_p + dh_p * nc_p + dh_p + nc_p) * w_item
    need_resident = stream_bytes + weights_1x + (2 << 20)
    use_ktiled = force_ktiled or (need_resident > vmem_cap)

    cost = pl.CostEstimate(
        flops=int(2 * B * (d_model * d_hidden + d_hidden * n_class)),
        transcendentals=0,
        bytes_accessed=int(x_p.size * x_item + b_p * nc_p * o_item
                           + (w1_p.size + b1_p.size + w2_p.size + b2_p.size)
                           * w_item),
    )

    x_mode = pl.Buffered(x_buffers) if x_buffers != 2 else None

    if not use_ktiled:
        # ------------------ resident-weight path ------------------
        def build(single_buffer_weights):
            w_mode = pl.Buffered(1) if single_buffer_weights else None
            w_factor = 1 if single_buffer_weights else 2
            vmem_needed = stream_bytes + w_factor * weights_1x + (2 << 20)
            vmem_limit = int(min(max(vmem_needed, 32 << 20), vmem_cap))
            return pl.pallas_call(
                classifier_kernel,
                out_shape=jax.ShapeDtypeStruct((b_p, nc_p), out_dtype),
                grid=(num_bt,),
                in_specs=[
                    _bspec((tb, dm_p), lambda i: (i, 0), x_mode),   # x streams
                    _bspec((dm_p, dh_p), lambda i: (0, 0), w_mode),  # W1 resident
                    _bspec((1, dh_p), lambda i: (0, 0), w_mode),     # b1 resident
                    _bspec((dh_p, nc_p), lambda i: (0, 0), w_mode),  # W2 resident
                    _bspec((1, nc_p), lambda i: (0, 0), w_mode),     # b2 resident
                ],
                out_specs=pl.BlockSpec((tb, nc_p), lambda i: (i, 0)),
                compiler_params=pltpu.CompilerParams(
                    dimension_semantics=("parallel",),
                    vmem_limit_bytes=vmem_limit),
                cost_estimate=cost,
            )

        try:
            out_p = build(True)(x_p, w1_p, b1_p, w2_p, b2_p)
        except Exception:
            # Fallback: this JAX/Mosaic build rejected single-buffered
            # (Buffered(1)) grid-invariant operands; use default buffering.
            out_p = build(False)(x_p, w1_p, b1_p, w2_p, b2_p)
    else:
        # ------------- contraction-tiled fallback (d_model) -------------
        # TODO(synk): if d_hidden also outgrows VMEM, additionally tile the
        # hidden dim of W2 (second reduction axis + logits accumulator).
        tk = _pick_k_tile(dm_p, k_tile)
        nk = dm_p // tk

        def build(single_buffer_weights):
            w_mode = pl.Buffered(1) if single_buffer_weights else None
            w_factor = 1 if single_buffer_weights else 2
            vmem_needed = (x_buffers * tb * tk * x_item          # x tiles
                           + 2 * tk * dh_p * w_item              # W1 k-slabs
                           + w_factor * (dh_p * nc_p + dh_p + nc_p) * w_item
                           + tb * dh_p * 4                       # f32 accumulator
                           + 2 * tb * nc_p * o_item + (2 << 20))
            vmem_limit = int(min(max(vmem_needed, 32 << 20), vmem_cap))
            return pl.pallas_call(
                classifier_kernel_ktiled,
                out_shape=jax.ShapeDtypeStruct((b_p, nc_p), out_dtype),
                grid=(num_bt, nk),                       # reduction axis last
                in_specs=[
                    _bspec((tb, tk), lambda i, k: (i, k), x_mode),
                    _bspec((tk, dh_p), lambda i, k: (k, 0)),        # W1 streams over k
                    _bspec((1, dh_p), lambda i, k: (0, 0), w_mode),
                    _bspec((dh_p, nc_p), lambda i, k: (0, 0), w_mode),
                    _bspec((1, nc_p), lambda i, k: (0, 0), w_mode),
                ],
                out_specs=pl.BlockSpec((tb, nc_p), lambda i, k: (i, 0)),
                scratch_shapes=[pltpu.VMEM((tb, dh_p), jnp.float32)],
                compiler_params=pltpu.CompilerParams(
                    dimension_semantics=("parallel", "arbitrary"),
                    vmem_limit_bytes=vmem_limit),
                cost_estimate=cost,
            )

        try:
            out_p = build(True)(x_p, w1_p, b1_p, w2_p, b2_p)
        except Exception:
            out_p = build(False)(x_p, w1_p, b1_p, w2_p, b2_p)

    # Slice real batch rows / real classes back out (drops padded lanes/rows).
    return out_p[:B, :n_class]


# ----------------------------------------------------------------------------
# Parameter init (mimics nn.Linear's uniform(-1/sqrt(fan_in), +))
# ----------------------------------------------------------------------------
def init_params(key, d_model, d_hidden, n_class, dtype=jnp.float32):
    k1, k2, k3, k4 = jax.random.split(key, 4)
    lim1 = 1.0 / jnp.sqrt(d_model)
    lim2 = 1.0 / jnp.sqrt(d_hidden)
    # Stored pre-transposed: [in, out]
    w1 = jax.random.uniform(k1, (d_model, d_hidden), jnp.float32, -lim1, lim1)
    b1 = jax.random.uniform(k2, (d_hidden,), jnp.float32, -lim1, lim1)
    w2 = jax.random.uniform(k3, (d_hidden, n_class), jnp.float32, -lim2, lim2)
    b2 = jax.random.uniform(k4, (n_class,), jnp.float32, -lim2, lim2)
    return (w1.astype(dtype), b1.astype(dtype),
            w2.astype(dtype), b2.astype(dtype))


if __name__ == "__main__":
    def ref_fn(x, w1, b1, w2, b2):
        return jnp.maximum(x @ w1 + b1, 0.0) @ w2 + b2

    # Small shapes consistent with the module's forward: x is [batch, d_model].
    B, d_model, d_hidden, n_class = 8, 32, 64, 16
    key = jax.random.PRNGKey(0)
    kx, kp = jax.random.split(key)
    x = jax.random.normal(kx, (B, d_model), jnp.float32)
    w1, b1, w2, b2 = init_params(kp, d_model, d_hidden, n_class)
    prepared = prepare_params(w1, b1, w2, b2)   # one-time weight padding

    # --- f32 path, single grid step (B < 16) ---
    out = jax.block_until_ready(classifier_forward(x, prepared))
    assert out.shape == (B, n_class)
    assert jnp.allclose(out, ref_fn(x, w1, b1, w2, b2), atol=1e-5, rtol=1e-5), \
        "f32 mismatch"

    # --- moderate batch: auto-split into >=2 grid steps (v7x dual-TC) ---
    B2 = 40
    x2 = jax.random.normal(jax.random.PRNGKey(1), (B2, d_model), jnp.float32)
    out2 = jax.block_until_ready(classifier_forward(x2, prepared))
    assert out2.shape == (B2, n_class)
    assert jnp.allclose(out2, ref_fn(x2, w1, b1, w2, b2), atol=1e-5, rtol=1e-5), \
        "split-batch mismatch"

    # --- explicit small batch tile: multi-step streaming grid ---
    out2b = jax.block_until_ready(classifier_forward(x2, prepared, tile_b=16))
    assert jnp.allclose(out2b, ref_fn(x2, w1, b1, w2, b2), atol=1e-5, rtol=1e-5), \
        "tiled f32 mismatch"

    # --- contraction-tiled fallback path (forced; d_model large enough for
    #     >=2 k steps) ---
    d_model3, B3 = 256, 24
    x3 = jax.random.normal(jax.random.PRNGKey(2), (B3, d_model3), jnp.float32)
    w1c, b1c, w2c, b2c = init_params(jax.random.PRNGKey(3),
                                     d_model3, d_hidden, n_class)
    prep3 = prepare_params(w1c, b1c, w2c, b2c)
    out3 = jax.block_until_ready(
        classifier_forward(x3, prep3, force_ktiled=True, k_tile=128))
    assert out3.shape == (B3, n_class)
    assert jnp.allclose(out3, ref_fn(x3, w1c, b1c, w2c, b2c),
                        atol=1e-4, rtol=1e-5), "k-tiled mismatch"

    # --- bf16 storage path with f32 logits out (full-rate MXU on v6e/v7x,
    #     f32 accumulation inside the kernel) ---
    xb = x.astype(jnp.bfloat16)
    prep_b = prepare_params(w1.astype(jnp.bfloat16), b1.astype(jnp.bfloat16),
                            w2.astype(jnp.bfloat16), b2.astype(jnp.bfloat16))
    outb = jax.block_until_ready(
        classifier_forward(xb, prep_b, out_dtype=jnp.float32))
    assert outb.shape == (B, n_class) and outb.dtype == jnp.float32
    assert bool(jnp.all(jnp.isfinite(outb)))

    print("KERNEL_OK")
</pallas_src>

<mosaic_0001>
module attributes {stable_mosaic.version = 11 : i64} {
  func.func @classifier_kernel(%arg0: i32, %arg1: memref<8x128xf32, #tpu.memory_space<vmem>>, %arg2: memref<128x128xf32, #tpu.memory_space<vmem>>, %arg3: memref<1x128xf32, #tpu.memory_space<vmem>>, %arg4: memref<128x128xf32, #tpu.memory_space<vmem>>, %arg5: memref<1x128xf32, #tpu.memory_space<vmem>>, %arg6: memref<8x128xf32, #tpu.memory_space<vmem>>) attributes {dimension_semantics = [#tpu.dimension_semantics<parallel>], iteration_bounds = array<i64: 1>, scalar_prefetch = 0 : i64, scratch_operands = 0 : i64, tpu.core_type = #tpu.core_type<tc>, window_params = [{transform_indices = @transform_0, window_bounds = array<i64: 8, 128>}, {pipeline_mode = #tpu.pipeline_mode<synchronous>, transform_indices = @transform_1, window_bounds = array<i64: 128, 128>}, {pipeline_mode = #tpu.pipeline_mode<synchronous>, transform_indices = @transform_2, window_bounds = array<i64: 1, 128>}, {pipeline_mode = #tpu.pipeline_mode<synchronous>, transform_indices = @transform_3, window_bounds = array<i64: 128, 128>}, {pipeline_mode = #tpu.pipeline_mode<synchronous>, transform_indices = @transform_4, window_bounds = array<i64: 1, 128>}, {transform_indices = @transform_5, window_bounds = array<i64: 8, 128>}]} {
    %c0 = arith.constant 0 : index
    %c0_0 = arith.constant 0 : index
    %0 = vector.load %arg1[%c0, %c0_0] : memref<8x128xf32, #tpu.memory_space<vmem>>, vector<8x128xf32>
    %c0_1 = arith.constant 0 : index
    %c0_2 = arith.constant 0 : index
    %1 = vector.load %arg2[%c0_1, %c0_2] : memref<128x128xf32, #tpu.memory_space<vmem>>, vector<128x128xf32>
    %cst = arith.constant dense<0.000000e+00> : vector<8x128xf32>
    %2 = tpu.matmul %0, %1, %cst {dimension_numbers = #tpu.dot_dimension_numbers<[1], [0], [0], [1], [0, 0, 1, 1], [], []>} : vector<8x128xf32>, vector<128x128xf32>, vector<8x128xf32> -> vector<8x128xf32>
    %c0_3 = arith.constant 0 : index
    %c0_4 = arith.constant 0 : index
    %3 = vector.load %arg3[%c0_3, %c0_4] : memref<1x128xf32, #tpu.memory_space<vmem>>, vector<1x128xf32>
    %4 = vector.broadcast %3 : vector<1x128xf32> to vector<8x128xf32>
    %5 = arith.addf %2, %4 : vector<8x128xf32>
    %cst_5 = arith.constant 0.000000e+00 : f32
    %6 = vector.broadcast %cst_5 : f32 to vector<8x128xf32>
    %7 = arith.maximumf %5, %6 : vector<8x128xf32>
    %c0_6 = arith.constant 0 : index
    %c0_7 = arith.constant 0 : index
    %8 = vector.load %arg4[%c0_6, %c0_7] : memref<128x128xf32, #tpu.memory_space<vmem>>, vector<128x128xf32>
    %cst_8 = arith.constant dense<0.000000e+00> : vector<8x128xf32>
    %9 = tpu.matmul %7, %8, %cst_8 {dimension_numbers = #tpu.dot_dimension_numbers<[1], [0], [0], [1], [0, 0, 1, 1], [], []>} : vector<8x128xf32>, vector<128x128xf32>, vector<8x128xf32> -> vector<8x128xf32>
    %c0_9 = arith.constant 0 : index
    %c0_10 = arith.constant 0 : index
    %10 = vector.load %arg5[%c0_9, %c0_10] : memref<1x128xf32, #tpu.memory_space<vmem>>, vector<1x128xf32>
    %11 = vector.broadcast %10 : vector<1x128xf32> to vector<8x128xf32>
    %12 = arith.addf %9, %11 : vector<8x128xf32>
    %c0_11 = arith.constant 0 : index
    %c0_12 = arith.constant 0 : index
    %13 = vector.load %arg6[%c0_11, %c0_12] : memref<8x128xf32, #tpu.memory_space<vmem>>, vector<8x128xf32>
    tpu.vector_store %arg6[%c0_11, %c0_12], %12 {strides = array<i32>} : memref<8x128xf32, #tpu.memory_space<vmem>>, vector<8x128xf32>,
    return
  }
  func.func @transform_0(%arg0: i32) -> (i32, i32) {
    %c0_i32 = arith.constant 0 : i32
    %c0_i32_0 = arith.constant 0 : i32
    return %arg0, %c0_i32 : i32, i32
  }
  func.func @transform_1(%arg0: i32) -> (i32, i32) {
    %c0_i32 = arith.constant 0 : i32
    %c0_i32_0 = arith.constant 0 : i32
    %c0_i32_1 = arith.constant 0 : i32
    return %c0_i32, %c0_i32_0 : i32, i32
  }
  func.func @transform_2(%arg0: i32) -> (i32, i32) {
    %c0_i32 = arith.constant 0 : i32
    %c0_i32_0 = arith.constant 0 : i32
    %c0_i32_1 = arith.constant 0 : i32
    return %c0_i32, %c0_i32_0 : i32, i32
  }
  func.func @transform_3(%arg0: i32) -> (i32, i32) {
    %c0_i32 = arith.constant 0 : i32
    %c0_i32_0 = arith.constant 0 : i32
    %c0_i32_1 = arith.constant 0 : i32
    return %c0_i32, %c0_i32_0 : i32, i32
  }
  func.func @transform_4(%arg0: i32) -> (i32, i32) {
    %c0_i32 = arith.constant 0 : i32
    %c0_i32_0 = arith.constant 0 : i32
    %c0_i32_1 = arith.constant 0 : i32
    return %c0_i32, %c0_i32_0 : i32, i32
  }
  func.func @transform_5(%arg0: i32) -> (i32, i32) {
    %c0_i32 = arith.constant 0 : i32
    %c0_i32_0 = arith.constant 0 : i32
    return %arg0, %c0_i32 : i32, i32
  }
}

module attributes {stable_mosaic.version = 11 : i64} {
  func.func @classifier_kernel(%arg0: i32, %arg1: memref<8x128xf32, #tpu.memory_space<vmem>>, %arg2: memref<128x128xf32, #tpu.memory_space<vmem>>, %arg3: memref<1x128xf32, #tpu.memory_space<vmem>>, %arg4: memref<128x128xf32, #tpu.memory_space<vmem>>, %arg5: memref<1x128xf32, #tpu.memory_space<vmem>>, %arg6: memref<8x128xf32, #tpu.memory_space<vmem>>) attributes {dimension_semantics = [#tpu.dimension_semantics<parallel>], iteration_bounds = array<i64: 1>, scalar_prefetch = 0 : i64, scratch_operands = 0 : i64, tpu.core_type = #tpu.core_type<tc>, window_params = [{transform_indices = @transform_0, window_bounds = array<i64: 8, 128>}, {pipeline_mode = #tpu.pipeline_mode<synchronous>, transform_indices = @transform_1, window_bounds = array<i64: 128, 128>}, {pipeline_mode = #tpu.pipeline_mode<synchronous>, transform_indices = @transform_2, window_bounds = array<i64: 1, 128>}, {pipeline_mode = #tpu.pipeline_mode<synchronous>, transform_indices = @transform_3, window_bounds = array<i64: 128, 128>}, {pipeline_mode = #tpu.pipeline_mode<synchronous>, transform_indices = @transform_4, window_bounds = array<i64: 1, 128>}, {transform_indices = @transform_5, window_bounds = array<i64: 8, 128>}]} {
    %c0 = arith.constant 0 : index
    %c0_0 = arith.constant 0 : index
    %0 = vector.load %arg1[%c0, %c0_0] : memref<8x128xf32, #tpu.memory_space<vmem>>, vector<8x128xf32>
    %c0_1 = arith.constant 0 : index
    %c0_2 = arith.constant 0 : index
    %1 = vector.load %arg2[%c0_1, %c0_2] : memref<128x128xf32, #tpu.memory_space<vmem>>, vector<128x128xf32>
    %cst = arith.constant dense<0.000000e+00> : vector<8x128xf32>
    %2 = tpu.matmul %0, %1, %cst {dimension_numbers = #tpu.dot_dimension_numbers<[1], [0], [0], [1], [0, 0, 1, 1], [], []>} : vector<8x128xf32>, vector<128x128xf32>, vector<8x128xf32> -> vector<8x128xf32>
    %c0_3 = arith.constant 0 : index
    %c0_4 = arith.constant 0 : index
    %3 = vector.load %arg3[%c0_3, %c0_4] : memref<1x128xf32, #tpu.memory_space<vmem>>, vector<1x128xf32>
    %4 = vector.broadcast %3 : vector<1x128xf32> to vector<8x128xf32>
    %5 = arith.addf %2, %4 : vector<8x128xf32>
    %cst_5 = arith.constant 0.000000e+00 : f32
    %6 = vector.broadcast %cst_5 : f32 to vector<8x128xf32>
    %7 = arith.maximumf %5, %6 : vector<8x128xf32>
    %c0_6 = arith.constant 0 : index
    %c0_7 = arith.constant 0 : index
    %8 = vector.load %arg4[%c0_6, %c0_7] : memref<128x128xf32, #tpu.memory_space<vmem>>, vector<128x128xf32>
    %cst_8 = arith.constant dense<0.000000e+00> : vector<8x128xf32>
    %9 = tpu.matmul %7, %8, %cst_8 {dimension_numbers = #tpu.dot_dimension_numbers<[1], [0], [0], [1], [0, 0, 1, 1], [], []>} : vector<8x128xf32>, vector<128x128xf32>, vector<8x128xf32> -> vector<8x128xf32>
    %c0_9 = arith.constant 0 : index
    %c0_10 = arith.constant 0 : index
    %10 = vector.load %arg5[%c0_9, %c0_10] : memref<1x128xf32, #tpu.memory_space<vmem>>, vector<1x128xf32>
    %11 = vector.broadcast %10 : vector<1x128xf32> to vector<8x128xf32>
    %12 = arith.addf %9, %11 : vector<8x128xf32>
    %c0_11 = arith.constant 0 : index
    %c0_12 = arith.constant 0 : index
    %13 = vector.load %arg6[%c0_11, %c0_12] : memref<8x128xf32, #tpu.memory_space<vmem>>, vector<8x128xf32>
    tpu.vector_store %arg6[%c0_11, %c0_12], %12 {strides = array<i32>} : memref<8x128xf32, #tpu.memory_space<vmem>>, vector<8x128xf32>,
    return
  }
  func.func @transform_0(%arg0: i32) -> (i32, i32) {
    %c0_i32 = arith.constant 0 : i32
    %c0_i32_0 = arith.constant 0 : i32
    return %arg0, %c0_i32 : i32, i32
  }
  func.func @transform_1(%arg0: i32) -> (i32, i32) {
    %c0_i32 = arith.constant 0 : i32
    %c0_i32_0 = arith.constant 0 : i32
    %c0_i32_1 = arith.constant 0 : i32
    return %c0_i32, %c0_i32_0 : i32, i32
  }
  func.func @transform_2(%arg0: i32) -> (i32, i32) {
    %c0_i32 = arith.constant 0 : i32
    %c0_i32_0 = arith.constant 0 : i32
    %c0_i32_1 = arith.constant 0 : i32
    return %c0_i32, %c0_i32_0 : i32, i32
  }
  func.func @transform_3(%arg0: i32) -> (i32, i32) {
    %c0_i32 = arith.constant 0 : i32
    %c0_i32_0 = arith.constant 0 : i32
    %c0_i32_1 = arith.constant 0 : i32
    return %c0_i32, %c0_i32_0 : i32, i32
  }
  func.func @transform_4(%arg0: i32) -> (i32, i32) {
    %c0_i32 = arith.constant 0 : i32
    %c0_i32_0 = arith.constant 0 : i32
    %c0_i32_1 = arith.constant 0 : i32
    return %c0_i32, %c0_i32_0 : i32, i32
  }
  func.func @transform_5(%arg0: i32) -> (i32, i32) {
    %c0_i32 = arith.constant 0 : i32
    %c0_i32_0 = arith.constant 0 : i32
    return %arg0, %c0_i32 : i32, i32
  }
}

</mosaic_0001>

<bundles_post_ra>
// kernel: tpu_custom_call.1
= control target key start
LH: loop header
LB: loop body
LE: loop exit
PB: predicated region body
PF: predicated region fallthrough
CT: control target
= control target key end

     0   :  { %10 = vsyncpa [#allocation3], 0  ;;  %s637_s0 = inlined_call_operand.hbm [shape: f32[8,128], index: 0, kind: input, shape index: {}]   ;;  %s638_s1 = inlined_call_operand.hbm [shape: f32[128,128], index: 1, kind: input, shape index: {}]   ;;  %s639_s2 = inlined_call_operand.vmem [shape: f32[1,128], index: 2, kind: input, shape index: {}]   ;;  %s640_s3 = inlined_call_operand.hbm [shape: f32[128,128], index: 3, kind: input, shape index: {}]   ;;  %s641_s4 = inlined_call_operand.vmem [shape: f32[1,128], index: 4, kind: input, shape index: {}]   ;;  %s642_s5 = inlined_call_operand.hbm [shape: f32[8,128], index: 5, kind: output, shape index: {}]  }
   0x1   :  { %11 = vsyncpa [#allocation6], 0 }
   0x2   :  { %12 = vsyncpa [#allocation4], 0  ;;  %s522_s18 = smov [#allocation5]   ;;  %s428_s22 = scalar_lea.hbm %s638_s1, 2048 }
   0x3   :  { %s28_s19 = sshll.u32 %s522_s18, 4  ;;  %p429_p0 = scmp.ne.s32.totalorder %s638_s1, %s428_s22  ;;  %s29_s19 = int_to_ptr.vmem [resolvable:$true] %s28_s19 }
   0x4   :  { %p432_p1 = scmp.lt.u32.totalorder %s428_s22, %s638_s1 }
   0x6   :  { %p434_p2 = pnand %p432_p1, %p429_p0 }
   0x8   :  { %437 = shalt.err (!%p434_p2)
}
   0x9   :  { %s438_s27 = scalar_lea.vmem %s29_s19, 2048  ;;  %p443_p4 = scmp.lt.s32.totalorder %s29_s19, %s29_s19 }
   0xa   :  { %p439_p3 = scmp.ne.s32.totalorder %s29_s19, %s438_s27  ;;  %p444_p5 = scmp.lt.s32.totalorder %s438_s27, %s438_s27 }
   0xc   :  { %p445_p6 = por %p444_p5, %p443_p4 }
   0xe   :  { %p446_p7 = pnand %p445_p6, %p439_p3 }
  0x10   :  { %449 = shalt.err (!%p446_p7)
}
  0x11   :  { %s523_s28 = smov 128   ;;  %s524_s29 = smov 8  }
  0x12   :  { %34 = dma.hbm_to_vmem [thread:$0]  %s638_s1, 2048, %s29_s19, [#allocation6], %s523_s28, %s523_s28, %s524_s29  }
  0x13   :  { %s525_s7 = smov [#allocation2]   ;;  %s526_s9 = smov [#allocation7]  }
  0x14   :  { %s19_s8 = sshll.u32 %s525_s7, 4  ;;  %s42_s10 = sshll.u32 %s526_s9, 4  ;;  %s20_s8 = int_to_ptr.vmem [resolvable:$true] %s19_s8  ;;  %s43_s10 = int_to_ptr.vmem [resolvable:$true] %s42_s10 }
  0x15   :  { %s450_s13 = scalar_lea.hbm %s637_s0, 128 }
  0x16   :  { %p451_p8 = scmp.ne.s32.totalorder %s637_s0, %s450_s13  ;;  %p454_p9 = scmp.lt.u32.totalorder %s450_s13, %s637_s0 }
  0x18   :  { %p456_p10 = pnand %p454_p9, %p451_p8 }
  0x1a   :  { %459 = shalt.err (!%p456_p10)
}
  0x1b   :  { %s460_s1 = scalar_lea.vmem %s20_s8, 128  ;;  %p465_p12 = scmp.lt.s32.totalorder %s20_s8, %s20_s8 }
  0x1c   :  { %p461_p11 = scmp.ne.s32.totalorder %s20_s8, %s460_s1  ;;  %p466_p13 = scmp.lt.s32.totalorder %s460_s1, %s460_s1 }
  0x1e   :  { %p467_p0 = por %p466_p13, %p465_p12 }
  0x20   :  { %p468_p1 = pnand %p467_p0, %p461_p11 }
  0x22   :  { %471 = shalt.err (!%p468_p1)
}
  0x23   :  { %22 = dma.hbm_to_vmem [thread:$0]  %s637_s0, 128, %s20_s8, [#allocation3]  }
  0x24   :  { %s472_s22 = scalar_lea.hbm %s640_s3, 2048 }
  0x25   :  { %p473_p2 = scmp.ne.s32.totalorder %s640_s3, %s472_s22  ;;  %p476_p3 = scmp.lt.u32.totalorder %s472_s22, %s640_s3 }
  0x27   :  { %p478_p4 = pnand %p476_p3, %p473_p2 }
  0x29   :  { %481 = shalt.err (!%p478_p4)
}
  0x2a   :  { %s482_s27 = scalar_lea.vmem %s43_s10, 2048  ;;  %p487_p6 = scmp.lt.s32.totalorder %s43_s10, %s43_s10 }
  0x2b   :  { %p483_p5 = scmp.ne.s32.totalorder %s43_s10, %s482_s27  ;;  %p488_p7 = scmp.lt.s32.totalorder %s482_s27, %s482_s27 }
  0x2d   :  { %p489_p8 = por %p488_p7, %p487_p6 }
  0x2f   :  { %p490_p9 = pnand %p489_p8, %p483_p5 }
  0x31   :  { %493 = shalt.err (!%p490_p9)
}
  0x32   :  { %48 = dma.hbm_to_vmem [thread:$0]  %s640_s3, 2048, %s43_s10, [#allocation6], %s523_s28, %s523_s28, %s524_s29  }
  0x33   :  { %516 = dma.done.wait [#allocation3], 128  }
  0x34   :  { %517 = vsyncadd [#allocation3], 4294967168 }
  0x35   :  { %518 = dma.done.wait [#allocation6], 4096  }
  0x36   :  { %519 = vsyncadd [#allocation6], 4294963200  ;;  %v527_v0 = vmov 0.0|0.0   ;;  %vm528_vm0 = vmmov 0   ;;  %v529_v1 = vmov 0.0   ;;  %v61_v2 = vld [vmem:[#allocation5] sm:$0xff] }
  0x37   :  { %371 = vmatprep.subr.bf16.mxu0 %v527_v0  ;;  %333 = vmatprep.mubr.msk.f32.mxu0 %vm528_vm0, %v529_v1  ;;  %v62_v3 = vld [vmem:[#allocation5 + $0x8] sm:$0xff]  ;;  %v63_v4 = vld [vmem:[#allocation5 + $0x10] sm:$0xff]  ;;  %v64_v6 = vld [vmem:[#allocation5 + $0x18] sm:$0xff]  ;;  %s530_s7 = smov [#allocation8]  }
  0x38   :  { %395 = vmatprep.subr.bf16.mxu1 %v527_v0  ;;  %368 = vmatprep.mubr.msk.f32.mxu1 %vm528_vm0, %v529_v1  ;;  %v372_v5 = vpack.c.bf16 %v62_v3, %v61_v2  ;;  %v375_v7 = vpack.c.bf16 %v64_v6, %v63_v4  ;;  %v65_v8 = vld [vmem:[#allocation5 + $0x20] sm:$0xff]  ;;  %v66_v9 = vld [vmem:[#allocation5 + $0x28] sm:$0xff]  ;;  %v157_v12 = vld [vmem:[#allocation7 + $0x10] sm:$0xff]  ;;  %s255_s8 = sshll.u32 %s530_s7, 4  ;;  %s256_s8 = int_to_ptr.vmem [resolvable:$true] %s255_s8 }
  0x39   :  { %v155_v10 = vld [vmem:[#allocation7] sm:$0xff]  ;;  %v156_v11 = vld [vmem:[#allocation7 + $0x8] sm:$0xff]  ;;  %v158_v13 = vld [vmem:[#allocation7 + $0x18] sm:$0xff]  ;;  %v378_v14 = vpack.c.bf16 %v66_v9, %v65_v8  ;;  %s494_s9 = scalar_lea.vmem %s256_s8, 128  ;;  %p499_p11 = scmp.lt.s32.totalorder %s256_s8, %s256_s8 }
  0x3a   :  { %373 = vmatpush3.bf16.msra.mxu0 %v372_v5  ;;  %v396_v15 = vpack.c.bf16 %v156_v11, %v155_v10  ;;  %v67_v16 = vld [vmem:[#allocation5 + $0x30] sm:$0xff]  ;;  %v68_v17 = vld [vmem:[#allocation5 + $0x38] sm:$0xff]  ;;  %v399_v18 = vpack.c.bf16 %v158_v13, %v157_v12  ;;  %v159_v19 = vld [vmem:[#allocation7 + $0x20] sm:$0xff]  ;;  %p495_p10 = scmp.ne.s32.totalorder %s256_s8, %s494_s9  ;;  %p500_p12 = scmp.lt.s32.totalorder %s494_s9, %s494_s9 }
  0x3b   :  { %374 = vmatprep.subr.bf16.mxu0 %v527_v0  ;;  %v160_v20 = vld [vmem:[#allocation7 + $0x28] sm:$0xff]  ;;  %v381_v21 = vpack.c.bf16 %v68_v17, %v67_v16  ;;  %v69_v22 = vld [vmem:[#allocation5 + $0x40] sm:$0xff]  ;;  %v161_v25 = vld [vmem:[#allocation7 + $0x30] sm:$0xff] }
  0x3c   :  { %397 = vmatpush3.bf16.msra.mxu1 %v396_v15  ;;  %v70_v23 = vld [vmem:[#allocation5 + $0x48] sm:$0xff]  ;;  %v402_v24 = vpack.c.bf16 %v160_v20, %v159_v19  ;;  %v162_v26 = vld [vmem:[#allocation7 + $0x38] sm:$0xff]  ;;  %v71_v28 = vld [vmem:[#allocation5 + $0x50] sm:$0xff]  ;;  %p501_p13 = por %p500_p12, %p499_p11 }
  0x3d   :  { %398 = vmatprep.subr.bf16.mxu1 %v527_v0  ;;  %v384_v27 = vpack.c.bf16 %v70_v23, %v69_v22  ;;  %v72_v29 = vld [vmem:[#allocation5 + $0x58] sm:$0xff]  ;;  %v405_v30 = vpack.c.bf16 %v162_v26, %v161_v25  ;;  %v163_v31 = vld [vmem:[#allocation7 + $0x40] sm:$0xff]  ;;  %v164_v32 = vld [vmem:[#allocation7 + $0x48] sm:$0xff] }
  0x3e   :  { %376 = vmatpush3.bf16.msra.mxu0 %v375_v7  ;;  %v387_v33 = vpack.c.bf16 %v72_v29, %v71_v28  ;;  %v73_v34 = vld [vmem:[#allocation5 + $0x60] sm:$0xff]  ;;  %v74_v35 = vld [vmem:[#allocation5 + $0x68] sm:$0xff]  ;;  %v408_v36 = vpack.c.bf16 %v164_v32, %v163_v31  ;;  %v165_v37 = vld [vmem:[#allocation7 + $0x50] sm:$0xff]  ;;  %p502_p0 = pnand %p501_p13, %p495_p10 }
  0x3f   :  { %377 = vmatprep.subr.bf16.mxu0 %v527_v0  ;;  %v166_v38 = vld [vmem:[#allocation7 + $0x58] sm:$0xff]  ;;  %v390_v39 = vpack.c.bf16 %v74_v35, %v73_v34  ;;  %v75_v40 = vld [vmem:[#allocation5 + $0x70] sm:$0xff]  ;;  %v167_v43 = vld [vmem:[#allocation7 + $0x60] sm:$0xff] }
  0x40   :  { %400 = vmatpush3.bf16.msra.mxu1 %v399_v18  ;;  %v76_v41 = vld [vmem:[#allocation5 + $0x78] sm:$0xff]  ;;  %v411_v42 = vpack.c.bf16 %v166_v38, %v165_v37  ;;  %v168_v44 = vld [vmem:[#allocation7 + $0x68] sm:$0xff]  ;;  %v169_v48 = vld [vmem:[#allocation7 + $0x70] sm:$0xff] }
  0x41   :  { %401 = vmatprep.subr.bf16.mxu1 %v527_v0  ;;  %v393_v45 = vpack.c.bf16 %v76_v41, %v75_v40  ;;  %v414_v46 = vpack.c.bf16 %v168_v44, %v167_v43  ;;  %v60_v47 = vld [vmem:[#allocation2] sm:$0xff] }
  0x42   :  { %379 = vmatpush3.bf16.msra.mxu0 %v378_v14  ;;  %v170_v49 = vld [vmem:[#allocation7 + $0x78] sm:$0xff] }
  0x43   :  { %380 = vmatprep.subr.bf16.mxu0 %v527_v0  ;;  %v417_v50 = vpack.c.bf16 %v170_v49, %v169_v48  ;;  %v265_v51 = vld [vmem:[%s639_s2] ss:$0 sm:$0xff] }
  0x44   :  { %403 = vmatpush3.bf16.msra.mxu1 %v402_v24  ;;  %v266_v56 = vld [vmem:[%s641_s4] ss:$0 sm:$0xff] }
  0x45   :  { %404 = vmatprep.subr.bf16.mxu1 %v527_v0 }
  0x46   :  { %382 = vmatpush3.bf16.msra.mxu0 %v381_v21 }
  0x47   :  { %383 = vmatprep.subr.bf16.mxu0 %v527_v0 }
  0x48   :  { %406 = vmatpush3.bf16.msra.mxu1 %v405_v30 }
  0x49   :  { %407 = vmatprep.subr.bf16.mxu1 %v527_v0 }
  0x4a   :  { %385 = vmatpush3.bf16.msra.mxu0 %v384_v27 }
  0x4b   :  { %386 = vmatprep.subr.bf16.mxu0 %v527_v0 }
  0x4c   :  { %409 = vmatpush3.bf16.msra.mxu1 %v408_v36 }
  0x4d   :  { %410 = vmatprep.subr.bf16.mxu1 %v527_v0 }
  0x4e   :  { %388 = vmatpush3.bf16.msra.mxu0 %v387_v33 }
  0x4f   :  { %389 = vmatprep.subr.bf16.mxu0 %v527_v0 }
  0x50   :  { %412 = vmatpush3.bf16.msra.mxu1 %v411_v42 }
  0x51   :  { %413 = vmatprep.subr.bf16.mxu1 %v527_v0 }
  0x52   :  { %391 = vmatpush3.bf16.msra.mxu0 %v390_v39 }
  0x53   :  { %392 = vmatprep.subr.bf16.mxu0 %v527_v0 }
  0x54   :  { %415 = vmatpush3.bf16.msra.mxu1 %v414_v46 }
  0x55   :  { %416 = vmatprep.subr.bf16.mxu1 %v527_v0 }
  0x56   :  { %394 = vmatpush3.bf16.msra.mxu0 %v393_v45 }
  0x58   :  { %418 = vmatpush3.bf16.msra.mxu1 %v417_v50 }
  0x59   :  { %334 = vmatmul.mubr.f32.vlgmr.msra.gmra.mrb[0].mxu0 %v60_v47 }
 0x12c   :  { %v150_v52 = vpop.f32.mrb[0].mxu0 }
 0x12d   :  { %v151_v53 = vadd.f32 %v265_v51, %v150_v52  ;;  %v335_v54 = vpop.f32.mrb[1].mxu0 }
 0x12f   :  { %v154_v55 = vmax.f32 %v151_v53, 0.0 }
 0x131   :  { %369 = vmatmul.mubr.f32.vlgmr.msra.gmra.mrb[0].mxu1 %v154_v55 }
 0x204   :  { %v244_v57 = vpop.f32.mrb[0].mxu1 }
 0x205   :  { %v245_v58 = vadd.f32 %v266_v56, %v244_v57  ;;  %v370_v59 = vpop.f32.mrb[1].mxu1 }
 0x207   :  { %248 = vst [vmem:[#allocation8] sm:$0xff] %v245_v58 }
 0x208   :  { %505 = shalt.err (!%p502_p0)
}
 0x209   :  { %s506_s11 = scalar_lea.hbm %s642_s5, 128 }
 0x20a   :  { %p507_p1 = scmp.ne.s32.totalorder %s642_s5, %s506_s11  ;;  %p510_p2 = scmp.lt.u32.totalorder %s506_s11, %s642_s5 }
 0x20c   :  { %p512_p3 = pnand %p510_p2, %p507_p1 }
 0x20e   :  { %515 = shalt.err (!%p512_p3)
}
 0x20f   :  { %258 = dma.vmem_to_hbm [thread:$0]  %s256_s8, 128, %s642_s5, [#allocation4]  }
 0x210   :  { %520 = dma.done.wait [#allocation4], 128  }
 0x211   :  { %521 = vsyncadd [#allocation4], 4294967168 }
 0x212   :  { %262 = vsyncpa [#allocation3], 1 }
 0x213   :  { %263 = vsyncpa [#allocation6], 1 }
 0x214   :  { %264 = vsyncpa [#allocation4], 1 }

// kernel: tpu_custom_call.1
= control target key start
LH: loop header
LB: loop body
LE: loop exit
PB: predicated region body
PF: predicated region fallthrough
CT: control target
= control target key end

     0   :  { %10 = vsyncpa [#allocation3], 0  ;;  %s637_s0 = inlined_call_operand.hbm [shape: f32[8,128], index: 0, kind: input, shape index: {}]   ;;  %s638_s1 = inlined_call_operand.hbm [shape: f32[128,128], index: 1, kind: input, shape index: {}]   ;;  %s639_s2 = inlined_call_operand.vmem [shape: f32[1,128], index: 2, kind: input, shape index: {}]   ;;  %s640_s3 = inlined_call_operand.hbm [shape: f32[128,128], index: 3, kind: input, shape index: {}]   ;;  %s641_s4 = inlined_call_operand.vmem [shape: f32[1,128], index: 4, kind: input, shape index: {}]   ;;  %s642_s5 = inlined_call_operand.hbm [shape: f32[8,128], index: 5, kind: output, shape index: {}]  }
   0x1   :  { %11 = vsyncpa [#allocation6], 0 }
   0x2   :  { %12 = vsyncpa [#allocation4], 0  ;;  %s522_s18 = smov [#allocation5]   ;;  %s428_s22 = scalar_lea.hbm %s638_s1, 2048 }
   0x3   :  { %s28_s19 = sshll.u32 %s522_s18, 4  ;;  %p429_p0 = scmp.ne.s32.totalorder %s638_s1, %s428_s22  ;;  %s29_s19 = int_to_ptr.vmem [resolvable:$true] %s28_s19 }
   0x4   :  { %p432_p1 = scmp.lt.u32.totalorder %s428_s22, %s638_s1 }
   0x6   :  { %p434_p2 = pnand %p432_p1, %p429_p0 }
   0x8   :  { %437 = shalt.err (!%p434_p2)
}
   0x9   :  { %s438_s27 = scalar_lea.vmem %s29_s19, 2048  ;;  %p443_p4 = scmp.lt.s32.totalorder %s29_s19, %s29_s19 }
   0xa   :  { %p439_p3 = scmp.ne.s32.totalorder %s29_s19, %s438_s27  ;;  %p444_p5 = scmp.lt.s32.totalorder %s438_s27, %s438_s27 }
   0xc   :  { %p445_p6 = por %p444_p5, %p443_p4 }
   0xe   :  { %p446_p7 = pnand %p445_p6, %p439_p3 }
  0x10   :  { %449 = shalt.err (!%p446_p7)
}
  0x11   :  { %s523_s28 = smov 128   ;;  %s524_s29 = smov 8  }
  0x12   :  { %34 = dma.hbm_to_vmem [thread:$0]  %s638_s1, 2048, %s29_s19, [#allocation6], %s523_s28, %s523_s28, %s524_s29  }
  0x13   :  { %s525_s7 = smov [#allocation2]   ;;  %s526_s9 = smov [#allocation7]  }
  0x14   :  { %s19_s8 = sshll.u32 %s525_s7, 4  ;;  %s42_s10 = sshll.u32 %s526_s9, 4  ;;  %s20_s8 = int_to_ptr.vmem [resolvable:$true] %s19_s8  ;;  %s43_s10 = int_to_ptr.vmem [resolvable:$true] %s42_s10 }
  0x15   :  { %s450_s13 = scalar_lea.hbm %s637_s0, 128 }
  0x16   :  { %p451_p8 = scmp.ne.s32.totalorder %s637_s0, %s450_s13  ;;  %p454_p9 = scmp.lt.u32.totalorder %s450_s13, %s637_s0 }
  0x18   :  { %p456_p10 = pnand %p454_p9, %p451_p8 }
  0x1a   :  { %459 = shalt.err (!%p456_p10)
}
  0x1b   :  { %s460_s1 = scalar_lea.vmem %s20_s8, 128  ;;  %p465_p12 = scmp.lt.s32.totalorder %s20_s8, %s20_s8 }
  0x1c   :  { %p461_p11 = scmp.ne.s32.totalorder %s20_s8, %s460_s1  ;;  %p466_p13 = scmp.lt.s32.totalorder %s460_s1, %s460_s1 }
  0x1e   :  { %p467_p0 = por %p466_p13, %p465_p12 }
  0x20   :  { %p468_p1 = pnand %p467_p0, %p461_p11 }
  0x22   :  { %471 = shalt.err (!%p468_p1)
}
  0x23   :  { %22 = dma.hbm_to_vmem [thread:$0]  %s637_s0, 128, %s20_s8, [#allocation3]  }
  0x24   :  { %s472_s22 = scalar_lea.hbm %s640_s3, 2048 }
  0x25   :  { %p473_p2 = scmp.ne.s32.totalorder %s640_s3, %s472_s22  ;;  %p476_p3 = scmp.lt.u32.totalorder %s472_s22, %s640_s3 }
  0x27   :  { %p478_p4 = pnand %p476_p3, %p473_p2 }
  0x29   :  { %481 = shalt.err (!%p478_p4)
}
  0x2a   :  { %s482_s27 = scalar_lea.vmem %s43_s10, 2048  ;;  %p487_p6 = scmp.lt.s32.totalorder %s43_s10, %s43_s10 }
  0x2b   :  { %p483_p5 = scmp.ne.s32.totalorder %s43_s10, %s482_s27  ;;  %p488_p7 = scmp.lt.s32.totalorder %s482_s27, %s482_s27 }
  0x2d   :  { %p489_p8 = por %p488_p7, %p487_p6 }
  0x2f   :  { %p490_p9 = pnand %p489_p8, %p483_p5 }
  0x31   :  { %493 = shalt.err (!%p490_p9)
}
  0x32   :  { %48 = dma.hbm_to_vmem [thread:$0]  %s640_s3, 2048, %s43_s10, [#allocation6], %s523_s28, %s523_s28, %s524_s29  }
  0x33   :  { %516 = dma.done.wait [#allocation3], 128  }
  0x34   :  { %517 = vsyncadd [#allocation3], 4294967168 }
  0x35   :  { %518 = dma.done.wait [#allocation6], 4096  }
  0x36   :  { %519 = vsyncadd [#allocation6], 4294963200  ;;  %v527_v0 = vmov 0.0|0.0   ;;  %vm528_vm0 = vmmov 0   ;;  %v529_v1 = vmov 0.0   ;;  %v61_v2 = vld [vmem:[#allocation5] sm:$0xff] }
  0x37   :  { %371 = vmatprep.subr.bf16.mxu0 %v527_v0  ;;  %333 = vmatprep.mubr.msk.f32.mxu0 %vm528_vm0, %v529_v1  ;;  %v62_v3 = vld [vmem:[#allocation5 + $0x8] sm:$0xff]  ;;  %v63_v4 = vld [vmem:[#allocation5 + $0x10] sm:$0xff]  ;;  %v64_v6 = vld [vmem:[#allocation5 + $0x18] sm:$0xff]  ;;  %s530_s7 = smov [#allocation8]  }
  0x38   :  { %395 = vmatprep.subr.bf16.mxu1 %v527_v0  ;;  %368 = vmatprep.mubr.msk.f32.mxu1 %vm528_vm0, %v529_v1  ;;  %v372_v5 = vpack.c.bf16 %v62_v3, %v61_v2  ;;  %v375_v7 = vpack.c.bf16 %v64_v6, %v63_v4  ;;  %v65_v8 = vld [vmem:[#allocation5 + $0x20] sm:$0xff]  ;;  %v66_v9 = vld [vmem:[#allocation5 + $0x28] sm:$0xff]  ;;  %v157_v12 = vld [vmem:[#allocation7 + $0x10] sm:$0xff]  ;;  %s255_s8 = sshll.u32 %s530_s7, 4  ;;  %s256_s8 = int_to_ptr.vmem [resolvable:$true] %s255_s8 }
  0x39   :  { %v155_v10 = vld [vmem:[#allocation7] sm:$0xff]  ;;  %v156_v11 = vld [vmem:[#allocation7 + $0x8] sm:$0xff]  ;;  %v158_v13 = vld [vmem:[#allocation7 + $0x18] sm:$0xff]  ;;  %v378_v14 = vpack.c.bf16 %v66_v9, %v65_v8  ;;  %s494_s9 = scalar_lea.vmem %s256_s8, 128  ;;  %p499_p11 = scmp.lt.s32.totalorder %s256_s8, %s256_s8 }
  0x3a   :  { %373 = vmatpush3.bf16.msra.mxu0 %v372_v5  ;;  %v396_v15 = vpack.c.bf16 %v156_v11, %v155_v10  ;;  %v67_v16 = vld [vmem:[#allocation5 + $0x30] sm:$0xff]  ;;  %v68_v17 = vld [vmem:[#allocation5 + $0x38] sm:$0xff]  ;;  %v399_v18 = vpack.c.bf16 %v158_v13, %v157_v12  ;;  %v159_v19 = vld [vmem:[#allocation7 + $0x20] sm:$0xff]  ;;  %p495_p10 = scmp.ne.s32.totalorder %s256_s8, %s494_s9  ;;  %p500_p12 = scmp.lt.s32.totalorder %s494_s9, %s494_s9 }
  0x3b   :  { %374 = vmatprep.subr.bf16.mxu0 %v527_v0  ;;  %v160_v20 = vld [vmem:[#allocation7 + $0x28] sm:$0xff]  ;;  %v381_v21 = vpack.c.bf16 %v68_v17, %v67_v16  ;;  %v69_v22 = vld [vmem:[#allocation5 + $0x40] sm:$0xff]  ;;  %v161_v25 = vld [vmem:[#allocation7 + $0x30] sm:$0xff] }
  0x3c   :  { %397 = vmatpush3.bf16.msra.mxu1 %v396_v15  ;;  %v70_v23 = vld [vmem:[#allocation5 + $0x48] sm:$0xff]  ;;  %v402_v24 = vpack.c.bf16 %v160_v20, %v159_v19  ;;  %v162_v26 = vld [vmem:[#allocation7 + $0x38] sm:$0xff]  ;;  %v71_v28 = vld [vmem:[#allocation5 + $0x50] sm:$0xff]  ;;  %p501_p13 = por %p500_p12, %p499_p11 }
  0x3d   :  { %398 = vmatprep.subr.bf16.mxu1 %v527_v0  ;;  %v384_v27 = vpack.c.bf16 %v70_v23, %v69_v22  ;;  %v72_v29 = vld [vmem:[#allocation5 + $0x58] sm:$0xff]  ;;  %v405_v30 = vpack.c.bf16 %v162_v26, %v161_v25  ;;  %v163_v31 = vld [vmem:[#allocation7 + $0x40] sm:$0xff]  ;;  %v164_v32 = vld [vmem:[#allocation7 + $0x48] sm:$0xff] }
  0x3e   :  { %376 = vmatpush3.bf16.msra.mxu0 %v375_v7  ;;  %v387_v33 = vpack.c.bf16 %v72_v29, %v71_v28  ;;  %v73_v34 = vld [vmem:[#allocation5 + $0x60] sm:$0xff]  ;;  %v74_v35 = vld [vmem:[#allocation5 + $0x68] sm:$0xff]  ;;  %v408_v36 = vpack.c.bf16 %v164_v32, %v163_v31  ;;  %v165_v37 = vld [vmem:[#allocation7 + $0x50] sm:$0xff]  ;;  %p502_p0 = pnand %p501_p13, %p495_p10 }
  0x3f   :  { %377 = vmatprep.subr.bf16.mxu0 %v527_v0  ;;  %v166_v38 = vld [vmem:[#allocation7 + $0x58] sm:$0xff]  ;;  %v390_v39 = vpack.c.bf16 %v74_v35, %v73_v34  ;;  %v75_v40 = vld [vmem:[#allocation5 + $0x70] sm:$0xff]  ;;  %v167_v43 = vld [vmem:[#allocation7 + $0x60] sm:$0xff] }
  0x40   :  { %400 = vmatpush3.bf16.msra.mxu1 %v399_v18  ;;  %v76_v41 = vld [vmem:[#allocation5 + $0x78] sm:$0xff]  ;;  %v411_v42 = vpack.c.bf16 %v166_v38, %v165_v37  ;;  %v168_v44 = vld [vmem:[#allocation7 + $0x68] sm:$0xff]  ;;  %v169_v48 = vld [vmem:[#allocation7 + $0x70] sm:$0xff] }
  0x41   :  { %401 = vmatprep.subr.bf16.mxu1 %v527_v0  ;;  %v393_v45 = vpack.c.bf16 %v76_v41, %v75_v40  ;;  %v414_v46 = vpack.c.bf16 %v168_v44, %v167_v43  ;;  %v60_v47 = vld [vmem:[#allocation2] sm:$0xff] }
  0x42   :  { %379 = vmatpush3.bf16.msra.mxu0 %v378_v14  ;;  %v170_v49 = vld [vmem:[#allocation7 + $0x78] sm:$0xff] }
  0x43   :  { %380 = vmatprep.subr.bf16.mxu0 %v527_v0  ;;  %v417_v50 = vpack.c.bf16 %v170_v49, %v169_v48  ;;  %v265_v51 = vld [vmem:[%s639_s2] ss:$0 sm:$0xff] }
  0x44   :  { %403 = vmatpush3.bf16.msra.mxu1 %v402_v24  ;;  %v266_v56 = vld [vmem:[%s641_s4] ss:$0 sm:$0xff] }
  0x45   :  { %404 = vmatprep.subr.bf16.mxu1 %v527_v0 }
  0x46   :  { %382 = vmatpush3.bf16.msra.mxu0 %v381_v21 }
  0x47   :  { %383 = vmatprep.subr.bf16.mxu0 %v527_v0 }
  0x48   :  { %406 = vmatpush3.bf16.msra.mxu1 %v405_v30 }
  0x49   :  { %407 = vmatprep.subr.bf16.mxu1 %v527_v0 }
  0x4a   :  { %385 = vmatpush3.bf16.msra.mxu0 %v384_v27 }
  0x4b   :  { %386 = vmatprep.subr.bf16.mxu0 %v527_v0 }
  0x4c   :  { %409 = vmatpush3.bf16.msra.mxu1 %v408_v36 }
  0x4d   :  { %410 = vmatprep.subr.bf16.mxu1 %v527_v0 }
  0x4e   :  { %388 = vmatpush3.bf16.msra.mxu0 %v387_v33 }
  0x4f   :  { %389 = vmatprep.subr.bf16.mxu0 %v527_v0 }
  0x50   :  { %412 = vmatpush3.bf16.msra.mxu1 %v411_v42 }
  0x51   :  { %413 = vmatprep.subr.bf16.mxu1 %v527_v0 }
  0x52   :  { %391 = vmatpush3.bf16.msra.mxu0 %v390_v39 }
  0x53   :  { %392 = vmatprep.subr.bf16.mxu0 %v527_v0 }
  0x54   :  { %415 = vmatpush3.bf16.msra.mxu1 %v414_v46 }
  0x55   :  { %416 = vmatprep.subr.bf16.mxu1 %v527_v0 }
  0x56   :  { %394 = vmatpush3.bf16.msra.mxu0 %v393_v45 }
  0x58   :  { %418 = vmatpush3.bf16.msra.mxu1 %v417_v50 }
  0x59   :  { %334 = vmatmul.mubr.f32.vlgmr.msra.gmra.mrb[0].mxu0 %v60_v47 }
 0x12c   :  { %v150_v52 = vpop.f32.mrb[0].mxu0 }
 0x12d   :  { %v151_v53 = vadd.f32 %v265_v51, %v150_v52  ;;  %v335_v54 = vpop.f32.mrb[1].mxu0 }
 0x12f   :  { %v154_v55 = vmax.f32 %v151_v53, 0.0 }
 0x131   :  { %369 = vmatmul.mubr.f32.vlgmr.msra.gmra.mrb[0].mxu1 %v154_v55 }
 0x204   :  { %v244_v57 = vpop.f32.mrb[0].mxu1 }
 0x205   :  { %v245_v58 = vadd.f32 %v266_v56, %v244_v57  ;;  %v370_v59 = vpop.f32.mrb[1].mxu1 }
 0x207   :  { %248 = vst [vmem:[#allocation8] sm:$0xff] %v245_v58 }
 0x208   :  { %505 = shalt.err (!%p502_p0)
}
 0x209   :  { %s506_s11 = scalar_lea.hbm %s642_s5, 128 }
 0x20a   :  { %p507_p1 = scmp.ne.s32.totalorder %s642_s5, %s506_s11  ;;  %p510_p2 = scmp.lt.u32.totalorder %s506_s11, %s642_s5 }
 0x20c   :  { %p512_p3 = pnand %p510_p2, %p507_p1 }
 0x20e   :  { %515 = shalt.err (!%p512_p3)
}
 0x20f   :  { %258 = dma.vmem_to_hbm [thread:$0]  %s256_s8, 128, %s642_s5, [#allocation4]  }
 0x210   :  { %520 = dma.done.wait [#allocation4], 128  }
 0x211   :  { %521 = vsyncadd [#allocation4], 4294967168 }
 0x212   :  { %262 = vsyncpa [#allocation3], 1 }
 0x213   :  { %263 = vsyncpa [#allocation6], 1 }
 0x214   :  { %264 = vsyncpa [#allocation4], 1 }

</bundles_post_ra>
